<compile_context>
chip_gen: v7x
topology: tpu7x:2x2x1
jax: 0.10.0
libtpu: 0.0.40
codegen_flags: <defaults>
</compile_context>

<pallas_src>
import functools
import math

import jax
import jax.numpy as jnp
import numpy as np
from jax.experimental import pallas as pl
from jax.experimental.pallas import tpu as pltpu

_MIB = 1 << 20


def _build_pe(max_seq_len: int, d_model: int) -> jnp.ndarray:
    """Reproduce the exact (non-standard) PE table from the PyTorch __init__.

    Note: the original code uses angle = pos / 10000 ** (2*i/d_model) with i the
    actual even column index (not the pair index) -- reproduced faithfully.
    """
    pos = np.arange(max_seq_len, dtype=np.float64)[:, None]
    i = np.arange(0, d_model, 2, dtype=np.float64)[None, :]
    angle = pos / np.power(10000.0, 2.0 * i / d_model)
    pe = np.zeros((max_seq_len, d_model), dtype=np.float32)
    pe[:, 0::2] = np.sin(angle)
    n_cos = d_model // 2  # guard odd d_model (original code would IndexError)
    pe[:, 1::2] = np.cos(angle[:, :n_cos])
    return jnp.asarray(pe)[None, :, :]  # (1, max_seq_len, d_model)


def _pos_enc_kernel(x_ref, pe_ref, o_ref, *, scale):
    # Pure VPU fused mul-add on lane-dense blocks.  pe block has leading dim 1
    # and broadcasts against the (possibly) batched x block.
    o_ref[...] = scale * x_ref[...] + pe_ref[...]


def _round_down(x: int, m: int) -> int:
    return (x // m) * m


def _round_up(x: int, m: int) -> int:
    return -(-x // m) * m


def _vmem_limits():
    """(vmem_limit_bytes, pipeline_budget_bytes), generation-aware."""
    phys = None
    try:
        info = pltpu.get_tpu_info()
        phys = getattr(info, "vmem_capacity_bytes", None)
    except Exception:
        phys = None
    if not phys:
        phys = 64 * _MIB  # conservative fallback (v7x physical VMEM)
    vmem_limit = max(8 * _MIB, min(int(phys) // 2, 32 * _MIB))
    budget = max(2 * _MIB, vmem_limit - 4 * _MIB)  # headroom for compiler scratch
    return int(vmem_limit), int(budget)


def _choose_lane_width(total: int, max_width: int):
    """Largest multiple of 128 dividing `total`, capped at max_width.
    Returns None if 128 doesn't divide `total` (caller uses the natural (S,D) view)."""
    if total % 128 != 0:
        return None
    best = 128
    w = 128
    cap = min(total, max_width)
    while w <= cap:
        if total % w == 0:
            best = w
        w += 128
    return best


def _choose_rows_per_tile(n_rows: int, width: int, max_block_elems: int) -> int:
    """Rows per tile: a multiple of 8 (or the full extent when n_rows <= 8),
    sized so one block holds <= max_block_elems f32.  Used with a cdiv grid,
    so it does NOT need to divide n_rows exactly."""
    if n_rows <= 8:
        return n_rows  # full extent along the sublane axis (always legal)
    # TODO(synk): if width alone exceeds max_block_elems/8 (enormous, 128-indivisible
    # last dims) the 8-row minimum can overshoot the budget; out of scope here.
    max_rows = max(8, _round_down(max(max_block_elems // max(width, 1), 8), 8))
    return max(8, min(max_rows, _round_down(n_rows, 8)))


def positional_encoder(x: jnp.ndarray, pe: jnp.ndarray, d_model: int) -> jnp.ndarray:
    """x: (B, S, D) float32, pe: (1, max_seq_len >= S, D) float32 -> (B, S, D)."""
    B, S, D = x.shape
    assert pe.shape[0] == 1 and pe.shape[2] == D and pe.shape[1] >= S
    pe = pe[:, :S, :]  # robust slice (the module itself requires S == max_seq_len)
    scale = float(math.sqrt(d_model))

    vmem_limit, budget = _vmem_limits()
    # ~4 MiB f32 per block (measured 85%-of-roofline regime), bounded so the six
    # double-buffered pipeline blocks (x, pe, out) fit inside the scoped budget.
    max_block_elems = max(8 * 128, min(1 << 20, budget // (6 * 4)))

    total = S * D
    itemsize = 4
    x_bytes = B * total * itemsize
    pe_bytes = total * itemsize

    kernel = functools.partial(_pos_enc_kernel, scale=scale)
    cost = pl.CostEstimate(
        flops=2 * B * total,
        transcendentals=0,
        bytes_accessed=2 * x_bytes + pe_bytes,
    )

    # --- Fast path: whole problem in one VMEM step (pe DMA'd exactly once). ---
    if x_bytes <= 4 * _MIB and 2 * (2 * x_bytes + pe_bytes) <= budget:
        return pl.pallas_call(
            kernel,
            out_shape=jax.ShapeDtypeStruct((B, S, D), x.dtype),
            grid_spec=pltpu.PrefetchScalarGridSpec(
                num_scalar_prefetch=0,
                grid=(1,),
                in_specs=[
                    pl.BlockSpec((B, S, D), lambda i: (0, 0, 0)),
                    pl.BlockSpec((1, S, D), lambda i: (0, 0, 0)),
                ],
                out_specs=pl.BlockSpec((B, S, D), lambda i: (0, 0, 0)),
            ),
            compiler_params=pltpu.CompilerParams(
                dimension_semantics=("arbitrary",),
                vmem_limit_bytes=vmem_limit,
            ),
            cost_estimate=cost,
        )(x, pe)

    # --- General path: lane-dense (n_rows, W) view, cdiv-tiled rows. ---
    max_w = max(128, _round_down(max(max_block_elems // 8, 128), 128))
    W = _choose_lane_width(total, max_w)
    if W is None:
        # S*D not a multiple of 128: natural (S, D) view, rows still cdiv-tiled
        # (correct; stores on the last dim may be masked, VMEM stays bounded).
        n_rows, W = S, D
        x2, pe2 = x, pe
    else:
        n_rows = total // W
        x2 = x.reshape(B, n_rows, W)       # free row-major reshape
        pe2 = pe.reshape(1, n_rows, W)

    rows_per_tile = _choose_rows_per_tile(n_rows, W, max_block_elems)
    n_tiles = pl.cdiv(n_rows, rows_per_tile)
    # Megacore (v7x): make sure there are >= 2 grid steps to shard across TCs.
    if B * n_tiles < 2 and n_rows > 8:
        rows_per_tile = max(8, _round_up(-(-n_rows // 2), 8))
        n_tiles = pl.cdiv(n_rows, rows_per_tile)

    out2 = pl.pallas_call(
        kernel,
        out_shape=jax.ShapeDtypeStruct((B, n_rows, W), x.dtype),
        grid_spec=pltpu.PrefetchScalarGridSpec(
            num_scalar_prefetch=0,
            grid=(n_tiles, B),  # batch innermost (fastest-varying)
            in_specs=[
                pl.BlockSpec((1, rows_per_tile, W), lambda t, b: (b, t, 0)),
                # pe block index independent of b -> only re-DMA'd when the row
                # tile changes; stays VMEM-resident across the batch axis.
                pl.BlockSpec((1, rows_per_tile, W), lambda t, b: (0, t, 0)),
            ],
            out_specs=pl.BlockSpec((1, rows_per_tile, W), lambda t, b: (b, t, 0)),
        ),
        compiler_params=pltpu.CompilerParams(
            dimension_semantics=("parallel", "parallel"),
            vmem_limit_bytes=vmem_limit,
        ),
        cost_estimate=cost,
    )(x2, pe2)
    return out2.reshape(B, S, D)


if __name__ == "__main__":
    def _ref(x, pe, d):
        return math.sqrt(d) * x + pe

    # 1) Toy shape (single-block fast path): batch=2, seq=8, hidden=32.
    B, S, D = 2, 8, 32
    x = jax.random.normal(jax.random.PRNGKey(0), (B, S, D), dtype=jnp.float32)
    pe = _build_pe(max_seq_len=S, d_model=D)
    out = jax.block_until_ready(positional_encoder(x, pe, d_model=D))
    np.testing.assert_allclose(np.asarray(out), np.asarray(_ref(x, pe, D)),
                               rtol=1e-6, atol=1e-6)

    # 2) Module-default shape (d_model=300, max_seq_len=256).
    B2, S2, D2 = 2, 256, 300
    x2 = jax.random.normal(jax.random.PRNGKey(1), (B2, S2, D2), dtype=jnp.float32)
    pe2 = _build_pe(max_seq_len=S2, d_model=D2)
    out2 = jax.block_until_ready(positional_encoder(x2, pe2, d_model=D2))
    np.testing.assert_allclose(np.asarray(out2), np.asarray(_ref(x2, pe2, D2)),
                               rtol=1e-5, atol=1e-5)

    # 3) Larger shape exercising the lane-dense tiled general path (2 row tiles x 2 batch).
    B3, S3, D3 = 2, 4096, 512
    x3 = jax.random.normal(jax.random.PRNGKey(2), (B3, S3, D3), dtype=jnp.float32)
    pe3 = _build_pe(max_seq_len=S3, d_model=D3)
    out3 = jax.block_until_ready(positional_encoder(x3, pe3, d_model=D3))
    np.testing.assert_allclose(np.asarray(out3), np.asarray(_ref(x3, pe3, D3)),
                               rtol=1e-5, atol=1e-5)

    print("KERNEL_OK")
</pallas_src>

<mosaic_0001>
module attributes {stable_mosaic.version = 11 : i64} {
  func.func @_pos_enc_kernel(%arg0: i32, %arg1: memref<2x8x32xf32, #tpu.memory_space<vmem>>, %arg2: memref<1x8x32xf32, #tpu.memory_space<vmem>>, %arg3: memref<2x8x32xf32, #tpu.memory_space<vmem>>) attributes {dimension_semantics = [#tpu.dimension_semantics<arbitrary>], iteration_bounds = array<i64: 1>, scalar_prefetch = 0 : i64, scratch_operands = 0 : i64, tpu.core_type = #tpu.core_type<tc>, window_params = [{pipeline_mode = #tpu.pipeline_mode<synchronous>, transform_indices = @transform_0, window_bounds = array<i64: 2, 8, 32>}, {pipeline_mode = #tpu.pipeline_mode<synchronous>, transform_indices = @transform_1, window_bounds = array<i64: 1, 8, 32>}, {pipeline_mode = #tpu.pipeline_mode<synchronous>, transform_indices = @transform_2, window_bounds = array<i64: 2, 8, 32>}]} {
    %c0 = arith.constant 0 : index
    %c0_0 = arith.constant 0 : index
    %c0_1 = arith.constant 0 : index
    %0 = vector.load %arg1[%c0, %c0_0, %c0_1] : memref<2x8x32xf32, #tpu.memory_space<vmem>>, vector<2x8x32xf32>
    %cst = arith.constant 5.65685415 : f32
    %1 = vector.broadcast %cst : f32 to vector<2x8x32xf32>
    %2 = arith.mulf %1, %0 : vector<2x8x32xf32>
    %c0_2 = arith.constant 0 : index
    %c0_3 = arith.constant 0 : index
    %c0_4 = arith.constant 0 : index
    %3 = vector.load %arg2[%c0_2, %c0_3, %c0_4] : memref<1x8x32xf32, #tpu.memory_space<vmem>>, vector<1x8x32xf32>
    %4 = vector.broadcast %3 : vector<1x8x32xf32> to vector<2x8x32xf32>
    %5 = arith.addf %2, %4 : vector<2x8x32xf32>
    %c0_5 = arith.constant 0 : index
    %c0_6 = arith.constant 0 : index
    %c0_7 = arith.constant 0 : index
    %6 = vector.load %arg3[%c0_5, %c0_6, %c0_7] : memref<2x8x32xf32, #tpu.memory_space<vmem>>, vector<2x8x32xf32>
    tpu.vector_store %arg3[%c0_5, %c0_6, %c0_7], %5 {strides = array<i32>} : memref<2x8x32xf32, #tpu.memory_space<vmem>>, vector<2x8x32xf32>,
    return
  }
  func.func @transform_0(%arg0: i32) -> (i32, i32, i32) {
    %c0_i32 = arith.constant 0 : i32
    %c0_i32_0 = arith.constant 0 : i32
    %c0_i32_1 = arith.constant 0 : i32
    %c0_i32_2 = arith.constant 0 : i32
    return %c0_i32, %c0_i32_0, %c0_i32_1 : i32, i32, i32
  }
  func.func @transform_1(%arg0: i32) -> (i32, i32, i32) {
    %c0_i32 = arith.constant 0 : i32
    %c0_i32_0 = arith.constant 0 : i32
    %c0_i32_1 = arith.constant 0 : i32
    %c0_i32_2 = arith.constant 0 : i32
    return %c0_i32, %c0_i32_0, %c0_i32_1 : i32, i32, i32
  }
  func.func @transform_2(%arg0: i32) -> (i32, i32, i32) {
    %c0_i32 = arith.constant 0 : i32
    %c0_i32_0 = arith.constant 0 : i32
    %c0_i32_1 = arith.constant 0 : i32
    %c0_i32_2 = arith.constant 0 : i32
    return %c0_i32, %c0_i32_0, %c0_i32_1 : i32, i32, i32
  }
}

</mosaic_0001>

<bundles_post_ra>
// kernel: tpu_custom_call.1
= control target key start
LH: loop header
LB: loop body
LE: loop exit
PB: predicated region body
PF: predicated region fallthrough
CT: control target
= control target key end

     0   :  { %7 = vsyncpa [#allocation3], 0  ;;  %s205_s0 = inlined_call_operand.hbm [shape: f32[2,8,32], index: 0, kind: input, shape index: {}]   ;;  %s206_s1 = inlined_call_operand.hbm [shape: f32[1,8,32], index: 1, kind: input, shape index: {}]   ;;  %s207_s2 = inlined_call_operand.hbm [shape: f32[2,8,32], index: 2, kind: output, shape index: {}]  }
   0x1   :  { %8 = vsyncpa [#allocation6], 0 }
   0x2   :  { %9 = vsyncpa [#allocation4], 0  ;;  %s143_s9 = smov [#allocation2]   ;;  %s71_s13 = scalar_lea.hbm %s205_s0, 256 }
   0x3   :  { %s15_s10 = sshll.u32 %s143_s9, 4  ;;  %p72_p0 = scmp.ne.s32.totalorder %s205_s0, %s71_s13  ;;  %s16_s10 = int_to_ptr.vmem [resolvable:$true] %s15_s10 }
   0x4   :  { %p75_p1 = scmp.lt.u32.totalorder %s71_s13, %s205_s0 }
   0x6   :  { %p77_p2 = pnand %p75_p1, %p72_p0 }
   0x8   :  { %80 = shalt.err (!%p77_p2)
}
   0x9   :  { %s81_s18 = scalar_lea.vmem %s16_s10, 256  ;;  %p86_p4 = scmp.lt.s32.totalorder %s16_s10, %s16_s10 }
   0xa   :  { %p82_p3 = scmp.ne.s32.totalorder %s16_s10, %s81_s18  ;;  %p87_p5 = scmp.lt.s32.totalorder %s81_s18, %s81_s18 }
   0xc   :  { %p88_p6 = por %p87_p5, %p86_p4 }
   0xe   :  { %p89_p7 = pnand %p88_p6, %p82_p3 }
  0x10   :  { %92 = shalt.err (!%p89_p7)
}
  0x11   :  { %s144_s19 = smov 128   ;;  %s145_s20 = smov 8  }
  0x12   :  { %21 = dma.hbm_to_vmem [thread:$0]  %s205_s0, 256, %s16_s10, [#allocation3], %s144_s19, %s144_s19, %s145_s20  }
  0x13   :  { %s146_s23 = smov [#allocation5]   ;;  %s93_s27 = scalar_lea.hbm %s206_s1, 128 }
  0x14   :  { %s28_s24 = sshll.u32 %s146_s23, 4  ;;  %p94_p8 = scmp.ne.s32.totalorder %s206_s1, %s93_s27  ;;  %s29_s24 = int_to_ptr.vmem [resolvable:$true] %s28_s24 }
  0x15   :  { %p97_p9 = scmp.lt.u32.totalorder %s93_s27, %s206_s1 }
  0x17   :  { %p99_p10 = pnand %p97_p9, %p94_p8 }
  0x19   :  { %102 = shalt.err (!%p99_p10)
}
  0x1a   :  { %s103_s4 = scalar_lea.vmem %s29_s24, 128  ;;  %p108_p12 = scmp.lt.s32.totalorder %s29_s24, %s29_s24 }
  0x1b   :  { %p104_p11 = scmp.ne.s32.totalorder %s29_s24, %s103_s4  ;;  %p109_p13 = scmp.lt.s32.totalorder %s103_s4, %s103_s4 }
  0x1d   :  { %p110_p0 = por %p109_p13, %p108_p12 }
  0x1f   :  { %p111_p1 = pnand %p110_p0, %p104_p11 }
  0x21   :  { %114 = shalt.err (!%p111_p1)
}
  0x22   :  { %31 = dma.hbm_to_vmem [thread:$0]  %s206_s1, 128, %s29_s24, [#allocation6]  }
  0x23   :  { %137 = dma.done.wait [#allocation3], 256  }
  0x24   :  { %138 = vsyncadd [#allocation3], 4294967040 }
  0x25   :  { %139 = dma.done.wait [#allocation6], 128  }
  0x26   :  { %140 = vsyncadd [#allocation6], 4294967168  ;;  %v38_v0 = vld [vmem:[#allocation2] sm:$0xff]  ;;  %v42_v1 = vld [vmem:[#allocation5] sm:$0xff]  ;;  %s147_s6 = smov [#allocation7]   ;;  %vm45_vm0 = vcmask 261120  }
  0x27   :  { %v39_v2 = vld [vmem:[#allocation2 + $0x8] sm:$0xff]  ;;  %s53_s7 = sshll.u32 %s147_s6, 4  ;;  %v40_v3 = vmul.f32 5.656854, %v38_v0  ;;  %s54_s7 = int_to_ptr.vmem [resolvable:$true] %s53_s7 }
  0x28   :  { %v41_v4 = vmul.f32 5.656854, %v39_v2  ;;  %s115_s8 = scalar_lea.vmem %s54_s7, 256  ;;  %p120_p3 = scmp.lt.s32.totalorder %s54_s7, %s54_s7 }
  0x29   :  { %v43_v5 = vadd.f32 %v42_v1, %v40_v3  ;;  %p116_p2 = scmp.ne.s32.totalorder %s54_s7, %s115_s8  ;;  %p121_p4 = scmp.lt.s32.totalorder %s115_s8, %s115_s8 }
  0x2a   :  { %v44_v6 = vadd.f32 %v42_v1, %v41_v4 }
  0x2b   :  { %46 = vst.msk [vmem:[#allocation7] sm:$0xff] %vm45_vm0, %v43_v5  ;;  %p122_p5 = por %p121_p4, %p120_p3 }
  0x2c   :  { %47 = vst.msk [vmem:[#allocation7 + $0x8] sm:$0xff] %vm45_vm0, %v44_v6 }
  0x2d   :  { %p123_p6 = pnand %p122_p5, %p116_p2 }
  0x2f   :  { %126 = shalt.err (!%p123_p6)
}
  0x30   :  { %s127_s10 = scalar_lea.hbm %s207_s2, 256 }
  0x31   :  { %p128_p7 = scmp.ne.s32.totalorder %s207_s2, %s127_s10  ;;  %p131_p8 = scmp.lt.u32.totalorder %s127_s10, %s207_s2 }
  0x33   :  { %p133_p9 = pnand %p131_p8, %p128_p7 }
  0x35   :  { %136 = shalt.err (!%p133_p9)
}
  0x36   :  { %59 = dma.vmem_to_hbm [thread:$0]  %s54_s7, 256, %s207_s2, [#allocation4], %s144_s19, %s144_s19, %s145_s20  }
  0x37   :  { %141 = dma.done.wait [#allocation4], 256  }
  0x38   :  { %142 = vsyncadd [#allocation4], 4294967040 }
  0x39   :  { %63 = vsyncpa [#allocation3], 1 }
  0x3a   :  { %64 = vsyncpa [#allocation6], 1 }
  0x3b   :  { %65 = vsyncpa [#allocation4], 1 }

</bundles_post_ra>
